<compile_context>
chip_gen: v7x
topology: tpu7x:2x2x1
jax: 0.10.0
libtpu: 0.0.40
codegen_flags: <defaults>
</compile_context>

<pallas_src>
import math
import numpy as np

import jax
import jax.numpy as jnp
from jax.experimental import pallas as pl
from jax.experimental.pallas import tpu as pltpu


OBJ_ROW = 8  # sublane row where the objectness feature block starts in the fused output


def _round_up(a, b):
    return ((a + b - 1) // b) * b


# ----------------------------------------------------------------------------
# Pallas kernel: one grid step == (one batch element) x (one HW lane-tile).
# Orientation: channels on sublanes, flattened (padded) spatial on lanes.
# ----------------------------------------------------------------------------
def make_rpn_kernel(T, Wp, Dp, level_scale):
    def kernel(x_ref,      # (1, 1, C, T_in) bf16  padded-image slab window (halo incl.)
               mask_ref,   # (1, T)          f32   1.0 on valid output lanes
               w1_ref,     # (9, 2C, C)      bf16  fused 3x3 conv weights (both branches)
               b1_ref,     # (2C, 1)         f32
               w2_ref,     # (Dp, 2C)        bf16  fused block-diagonal 1x1 conv weights
               b2_ref,     # (Dp, 1)         f32
               out_ref):   # (1, Dp, T)      f32   rows 0:4 deltas, rows 8:8+E raw obj feat
        # ---- 3x3 conv (pad=1), both branches fused on M: 9 accumulated K=C
        # matmuls over shifted lane windows — no tap concatenation. ----
        hid = None
        for tap in range(9):
            dy, dx = divmod(tap, 3)
            off = dy * Wp + dx
            part = jnp.dot(w1_ref[tap], x_ref[0, 0, :, off:off + T],
                           preferred_element_type=jnp.float32)      # (2C, T)
            hid = part if hid is None else hid + part
        hid = jnp.maximum(hid + b1_ref[...], 0.0)                    # ReLU, (2C, T) f32

        # ---- fused 1x1 convs (block-diagonal): rows 0:4 delta logits,
        #      rows OBJ_ROW:OBJ_ROW+E objectness features. ----
        pred = jnp.dot(w2_ref[...], hid.astype(jnp.bfloat16),
                       preferred_element_type=jnp.float32) + b2_ref[...]   # (Dp, T)

        valid = mask_ref[...] > 0.0                                  # (1, T) bool

        # rows 0:8 — anchor deltas: exp * level_scale, junk/pad lanes selected to 0
        # (select, not multiply, so exp overflow in junk lanes can never produce NaN).
        row8 = jax.lax.broadcasted_iota(jnp.int32, (8, 1), 0)
        d8 = jnp.where(row8 < 4, jnp.exp(pred[0:8, :]) * level_scale, 0.0)
        out_ref[0, 0:8, :] = jnp.where(valid, d8, 0.0)

        # rows 8:Dp — raw objectness features.  NOTE (invariant): junk columns
        # (x >= W) and HW-pad lanes hold conv garbage here and MUST be stripped
        # before any reduction; the wrapper strips them before the L2 norm.
        out_ref[0, OBJ_ROW:Dp, :] = pred[OBJ_ROW:Dp, :]
    return kernel


# ----------------------------------------------------------------------------
# Fuse / re-layout the PyTorch-style parameters once (tiny arrays, plain JAX).
# ----------------------------------------------------------------------------
def fuse_params(P):
    C = P["w1d"].shape[1]
    E = P["w2o"].shape[1]
    Dp = OBJ_ROW + _round_up(E, 8)

    # fused 3x3 conv, per-tap orientation: (9, 2C, C); block t = [w1d[t].T ; w1o[t].T]
    w1t = jnp.stack(
        [jnp.concatenate([P["w1d"][t].T, P["w1o"][t].T], axis=0) for t in range(9)],
        axis=0)                                                   # (9, 2C, C)
    b1t = jnp.concatenate([P["b1d"], P["b1o"]], axis=1).T         # (2C, 1)

    # fused block-diagonal 1x1 conv: (Dp, 2C)
    w2t = jnp.zeros((Dp, 2 * C), jnp.float32)
    w2t = w2t.at[0:4, 0:C].set(P["w2d"].T)
    w2t = w2t.at[OBJ_ROW:OBJ_ROW + E, C:2 * C].set(P["w2o"].T)
    b2t = jnp.zeros((Dp, 1), jnp.float32)
    b2t = b2t.at[0:4, 0].set(P["b2d"][0])
    b2t = b2t.at[OBJ_ROW:OBJ_ROW + E, 0].set(P["b2o"][0])

    emb = P["emb"]
    emb_n = emb / jnp.maximum(jnp.linalg.norm(emb, axis=1, keepdims=True), 1e-12)

    return {
        "w1t": w1t.astype(jnp.bfloat16),
        "b1t": b1t.astype(jnp.float32),
        "w2t": w2t.astype(jnp.bfloat16),
        "b2t": b2t.astype(jnp.float32),
        "emb_n": emb_n[0].astype(jnp.float32),                    # (E,)
        "E": E,
    }


# ----------------------------------------------------------------------------
# Per-level wrapper: zero-pad + flatten spatial, build halo'd HW-tile windows,
# call the kernel over grid (N, num_hw_tiles), strip junk lanes, finalize the
# objectness normalize / emb-dot / sigmoid (two-pass L2 norm over spatial).
# ----------------------------------------------------------------------------
def rpn_level_pallas(x_nchw, fused, level_scale, obj_scale, obj_bias,
                     max_hw_tile=2048):
    N, C, H, W = x_nchw.shape
    Hp, Wp = H + 2, W + 2
    HWo = H * Wp                              # flat output lanes incl. 2 junk cols/row
    E = fused["E"]
    Dp = fused["w2t"].shape[0]

    # lane-tile size: 128-aligned, capped (v7x 64 MiB VMEM budget at C=256)
    T = min(_round_up(HWo, 128), max(_round_up(max_hw_tile, 128), 128))
    nT = -(-HWo // T)
    HW_pad = nT * T
    halo = 2 * Wp + 2                          # max tap offset
    T_in = _round_up(T + halo, 128)

    # zero-padded image slab: channels on sublanes, flattened padded spatial on lanes
    xpad = jnp.pad(x_nchw, ((0, 0), (0, 0), (1, 1), (1, 1)))      # (N, C, Hp, Wp)
    slab = xpad.reshape(N, C, Hp * Wp).astype(jnp.bfloat16)
    slab_len = (nT - 1) * T + T_in
    slab = jnp.pad(slab, ((0, 0), (0, 0), (0, slab_len - Hp * Wp)))
    # per-HW-tile windows with halo (non-overlapping BlockSpec blocks; glue only)
    slab_tiles = jnp.stack([slab[:, :, t * T: t * T + T_in] for t in range(nT)],
                           axis=1)                                 # (N, nT, C, T_in)

    # hoisted validity mask: valid output lane <=> (lane % Wp) < W and lane < HWo
    g = jnp.arange(HW_pad, dtype=jnp.int32)
    valid = (((g % Wp) < W) & (g < HWo)).astype(jnp.float32).reshape(1, HW_pad)

    kernel = make_rpn_kernel(T, Wp, Dp, float(level_scale))

    grid_spec = pltpu.PrefetchScalarGridSpec(
        num_scalar_prefetch=0,
        grid=(N, nT),
        in_specs=[
            pl.BlockSpec((1, 1, C, T_in), lambda n, t: (n, t, 0, 0)),   # slab window
            pl.BlockSpec((1, T), lambda n, t: (0, t)),                  # validity mask
            pl.BlockSpec((9, 2 * C, C), lambda n, t: (0, 0, 0)),        # fused 3x3 w
            pl.BlockSpec((2 * C, 1), lambda n, t: (0, 0)),
            pl.BlockSpec((Dp, 2 * C), lambda n, t: (0, 0)),             # fused 1x1 w
            pl.BlockSpec((Dp, 1), lambda n, t: (0, 0)),
        ],
        out_specs=pl.BlockSpec((1, Dp, T), lambda n, t: (n, 0, t)),
    )

    out = pl.pallas_call(
        kernel,
        out_shape=jax.ShapeDtypeStruct((N, Dp, HW_pad), jnp.float32),
        grid_spec=grid_spec,
        compiler_params=pltpu.CompilerParams(
            dimension_semantics=("parallel", "arbitrary"),
            vmem_limit_bytes=48 * 1024 * 1024),
    )(slab_tiles, valid, fused["w1t"], fused["b1t"], fused["w2t"], fused["b2t"])

    # split + strip junk columns / pad lanes (layout already NC(HW), no transpose)
    deltas = out[:, 0:4, :HWo].reshape(N, 4, H, Wp)[..., :W]       # (N, 4, H, W)
    feat = out[:, OBJ_ROW:OBJ_ROW + E, :HWo].reshape(N, E, H, Wp)[..., :W]
    feat = feat.reshape(N, E, H * W)                               # (N, E, HW)

    # deferred objectness finalize: F.normalize over spatial (dim=1 of (N,HW,E)),
    # dot with the normalized CLIP embedding, affine, sigmoid (matches torch forward).
    norm = jnp.maximum(jnp.sqrt(jnp.sum(feat * feat, axis=2, keepdims=True)), 1e-12)
    logits = jnp.einsum("e,nes->ns", fused["emb_n"], feat / norm)
    obj = jax.nn.sigmoid(obj_scale * logits + obj_bias).reshape(N, 1, H, W)
    return obj, deltas


def star_rpn_head_forward(features, P, max_hw_tile=2048):
    fused = fuse_params(P)
    pred_objectness_logits, pred_anchor_deltas = [], []
    for level, x in enumerate(features):
        obj, deltas = rpn_level_pallas(x, fused, P["scales"][level],
                                       P["obj_scale"], P["obj_bias"],
                                       max_hw_tile=max_hw_tile)
        # NOTE: like the torch module, "objectness logits" are post-sigmoid probs.
        pred_objectness_logits.append(obj)
        pred_anchor_deltas.append(deltas)
    return pred_objectness_logits, pred_anchor_deltas


# ----------------------------------------------------------------------------
# Pure-JAX f32 reference (for verification of the Pallas kernel)
# ----------------------------------------------------------------------------
def ref_forward(features, P):
    pred_obj, pred_deltas = [], []
    for level, x_nchw in enumerate(features):
        N, C, H, W = x_nchw.shape
        E = P["w2o"].shape[1]
        xn = jnp.transpose(x_nchw, (0, 2, 3, 1))                  # NHWC

        def conv3x3(xn, w9, b):
            w = w9.reshape(3, 3, C, C)                            # HWIO
            y = jax.lax.conv_general_dilated(
                xn, w, (1, 1), "SAME", dimension_numbers=("NHWC", "HWIO", "NHWC"))
            return y + b.reshape(1, 1, 1, C)

        h_d = jax.nn.relu(conv3x3(xn, P["w1d"], P["b1d"]))
        deltas = jnp.einsum("nhwc,co->nhwo", h_d, P["w2d"]) + P["b2d"].reshape(1, 1, 1, 4)
        deltas = jnp.exp(deltas) * P["scales"][level]
        pred_deltas.append(jnp.transpose(deltas, (0, 3, 1, 2)))

        h_o = jax.nn.relu(conv3x3(xn, P["w1o"], P["b1o"]))
        feat = jnp.einsum("nhwc,ce->nhwe", h_o, P["w2o"]) + P["b2o"].reshape(1, 1, 1, E)
        feat = feat.reshape(N, H * W, E)
        norm = jnp.maximum(jnp.sqrt(jnp.sum(feat * feat, axis=1, keepdims=True)), 1e-12)
        featn = feat / norm
        logits = jnp.einsum("nse,e->ns", featn, P["emb"][0])
        obj = jax.nn.sigmoid(P["obj_scale"] * logits + P["obj_bias"]).reshape(N, 1, H, W)
        pred_obj.append(obj)
    return pred_obj, pred_deltas


# ----------------------------------------------------------------------------
# Deterministic parameter construction (mirrors StaRPNHead.__init__ shapes)
# ----------------------------------------------------------------------------
def build_params(key, hidden_dim, num_levels, emb_dim):
    C, E = hidden_dim, emb_dim
    ks = jax.random.split(key, 16)

    def xavier(k, shape, fan_in, fan_out):
        bound = math.sqrt(6.0 / (fan_in + fan_out))
        return jax.random.uniform(k, shape, jnp.float32, -bound, bound)

    def conv_bias(k, shape, fan_in):
        bound = 1.0 / math.sqrt(fan_in)
        return jax.random.uniform(k, shape, jnp.float32, -bound, bound)

    P = {
        # anchor_deltas: Conv2d(C,C,3) -> ReLU -> Conv2d(C,4,1)
        "w1d": xavier(ks[0], (9, C, C), C * 9, C * 9),
        "b1d": conv_bias(ks[1], (1, C), C * 9),
        "w2d": xavier(ks[2], (C, 4), C, 4),
        "b2d": conv_bias(ks[3], (1, 4), C),
        # objectness_logits: Conv2d(C,C,3) -> ReLU -> Conv2d(C,E,1)
        "w1o": xavier(ks[4], (9, C, C), C * 9, C * 9),
        "b1o": conv_bias(ks[5], (1, C), C * 9),
        "w2o": xavier(ks[6], (C, E), C, E),
        "b2o": conv_bias(ks[7], (1, E), C),
    }
    # TODO(synk): obj_embeddings come from torch.load(clip_obj_embedding_file);
    # replaced with a deterministic random embedding, L2-normalized along dim=1.
    emb = jax.random.normal(ks[8], (1, E), jnp.float32)
    P["emb"] = emb / jnp.maximum(jnp.linalg.norm(emb, axis=1, keepdims=True), 1e-12)

    P["scales"] = [1.0 for _ in range(num_levels)]                 # Scale(init=1.0)
    P["obj_scale"] = 1.0
    P["obj_bias"] = float(-math.log((1.0 - 0.01) / 0.01))          # bias_init_with_prob(0.01)
    return P


if __name__ == "__main__":
    hidden_dim = 32
    emb_dim = 32
    num_levels = 2
    N = 2

    key = jax.random.PRNGKey(0)
    kp, kx0, kx1 = jax.random.split(key, 3)
    P = build_params(kp, hidden_dim, num_levels, emb_dim)

    # list of NCHW feature maps, one per pyramid level
    features = [
        jax.random.normal(kx0, (N, hidden_dim, 16, 16), jnp.float32),
        jax.random.normal(kx1, (N, hidden_dim, 8, 8), jnp.float32),
    ]

    # max_hw_tile=256 so level 0 (HWo=288) exercises the multi-HW-tile path (nT=2)
    pred_obj, pred_deltas = star_rpn_head_forward(features, P, max_hw_tile=256)
    jax.block_until_ready(pred_obj)
    jax.block_until_ready(pred_deltas)

    ref_obj, ref_deltas = ref_forward(features, P)
    # bf16 MXU operands -> compare against the f32 reference at bf16 tolerance
    for lvl in range(num_levels):
        np.testing.assert_allclose(np.asarray(pred_obj[lvl]), np.asarray(ref_obj[lvl]),
                                   rtol=2e-2, atol=2e-2)
        np.testing.assert_allclose(np.asarray(pred_deltas[lvl]), np.asarray(ref_deltas[lvl]),
                                   rtol=2e-2, atol=2e-2)

    print("KERNEL_OK")
</pallas_src>

<mosaic_0001>
module attributes {stable_mosaic.version = 11 : i64} {
  func.func @kernel(%arg0: i32, %arg1: i32, %arg2: memref<1x1x32x384xbf16, #tpu.memory_space<vmem>>, %arg3: memref<1x256xf32, #tpu.memory_space<vmem>>, %arg4: memref<9x64x32xbf16, #tpu.memory_space<vmem>>, %arg5: memref<64x1xf32, #tpu.memory_space<vmem>>, %arg6: memref<40x64xbf16, #tpu.memory_space<vmem>>, %arg7: memref<40x1xf32, #tpu.memory_space<vmem>>, %arg8: memref<1x40x256xf32, #tpu.memory_space<vmem>>) attributes {dimension_semantics = [#tpu.dimension_semantics<parallel>, #tpu.dimension_semantics<arbitrary>], iteration_bounds = array<i64: 2, 2>, scalar_prefetch = 0 : i64, scratch_operands = 0 : i64, tpu.core_type = #tpu.core_type<tc>, window_params = [{transform_indices = @transform_0, window_bounds = array<i64: 1, 1, 32, 384>}, {transform_indices = @transform_1, window_bounds = array<i64: 1, 256>}, {pipeline_mode = #tpu.pipeline_mode<synchronous>, transform_indices = @transform_2, window_bounds = array<i64: 9, 64, 32>}, {pipeline_mode = #tpu.pipeline_mode<synchronous>, transform_indices = @transform_3, window_bounds = array<i64: 64, 1>}, {pipeline_mode = #tpu.pipeline_mode<synchronous>, transform_indices = @transform_4, window_bounds = array<i64: 40, 64>}, {pipeline_mode = #tpu.pipeline_mode<synchronous>, transform_indices = @transform_5, window_bounds = array<i64: 40, 1>}, {transform_indices = @transform_6, window_bounds = array<i64: 1, 40, 256>}]} {
    %c0 = arith.constant 0 : index
    %c0_0 = arith.constant 0 : index
    %c0_1 = arith.constant 0 : index
    %0 = vector.load %arg4[%c0, %c0_0, %c0_1] : memref<9x64x32xbf16, #tpu.memory_space<vmem>>, vector<1x64x32xbf16>
    %1 = vector.shape_cast %0 : vector<1x64x32xbf16> to vector<64x32xbf16>
    %c0_2 = arith.constant 0 : index
    %c0_3 = arith.constant 0 : index
    %c0_4 = arith.constant 0 : index
    %c0_5 = arith.constant 0 : index
    %2 = vector.load %arg2[%c0_2, %c0_3, %c0_4, %c0_5] : memref<1x1x32x384xbf16, #tpu.memory_space<vmem>>, vector<1x1x32x256xbf16>
    %3 = vector.shape_cast %2 : vector<1x1x32x256xbf16> to vector<32x256xbf16>
    %cst = arith.constant dense<0.000000e+00> : vector<64x256xf32>
    %4 = tpu.matmul %1, %3, %cst {dimension_numbers = #tpu.dot_dimension_numbers<[1], [0], [0], [1], [0, 0, 1, 1], [], []>} : vector<64x32xbf16>, vector<32x256xbf16>, vector<64x256xf32> -> vector<64x256xf32>
    %c1 = arith.constant 1 : index
    %c0_6 = arith.constant 0 : index
    %c0_7 = arith.constant 0 : index
    %5 = vector.load %arg4[%c1, %c0_6, %c0_7] : memref<9x64x32xbf16, #tpu.memory_space<vmem>>, vector<1x64x32xbf16>
    %6 = vector.shape_cast %5 : vector<1x64x32xbf16> to vector<64x32xbf16>
    %c0_8 = arith.constant 0 : index
    %c0_9 = arith.constant 0 : index
    %c0_10 = arith.constant 0 : index
    %c1_11 = arith.constant 1 : index
    %7 = vector.load %arg2[%c0_8, %c0_9, %c0_10, %c1_11] : memref<1x1x32x384xbf16, #tpu.memory_space<vmem>>, vector<1x1x32x256xbf16>
    %8 = vector.shape_cast %7 : vector<1x1x32x256xbf16> to vector<32x256xbf16>
    %cst_12 = arith.constant dense<0.000000e+00> : vector<64x256xf32>
    %9 = tpu.matmul %6, %8, %cst_12 {dimension_numbers = #tpu.dot_dimension_numbers<[1], [0], [0], [1], [0, 0, 1, 1], [], []>} : vector<64x32xbf16>, vector<32x256xbf16>, vector<64x256xf32> -> vector<64x256xf32>
    %10 = arith.addf %4, %9 : vector<64x256xf32>
    %c2 = arith.constant 2 : index
    %c0_13 = arith.constant 0 : index
    %c0_14 = arith.constant 0 : index
    %11 = vector.load %arg4[%c2, %c0_13, %c0_14] : memref<9x64x32xbf16, #tpu.memory_space<vmem>>, vector<1x64x32xbf16>
    %12 = vector.shape_cast %11 : vector<1x64x32xbf16> to vector<64x32xbf16>
    %c0_15 = arith.constant 0 : index
    %c0_16 = arith.constant 0 : index
    %c0_17 = arith.constant 0 : index
    %c2_18 = arith.constant 2 : index
    %13 = vector.load %arg2[%c0_15, %c0_16, %c0_17, %c2_18] : memref<1x1x32x384xbf16, #tpu.memory_space<vmem>>, vector<1x1x32x256xbf16>
    %14 = vector.shape_cast %13 : vector<1x1x32x256xbf16> to vector<32x256xbf16>
    %cst_19 = arith.constant dense<0.000000e+00> : vector<64x256xf32>
    %15 = tpu.matmul %12, %14, %cst_19 {dimension_numbers = #tpu.dot_dimension_numbers<[1], [0], [0], [1], [0, 0, 1, 1], [], []>} : vector<64x32xbf16>, vector<32x256xbf16>, vector<64x256xf32> -> vector<64x256xf32>
    %16 = arith.addf %10, %15 : vector<64x256xf32>
    %c3 = arith.constant 3 : index
    %c0_20 = arith.constant 0 : index
    %c0_21 = arith.constant 0 : index
    %17 = vector.load %arg4[%c3, %c0_20, %c0_21] : memref<9x64x32xbf16, #tpu.memory_space<vmem>>, vector<1x64x32xbf16>
    %18 = vector.shape_cast %17 : vector<1x64x32xbf16> to vector<64x32xbf16>
    %c0_22 = arith.constant 0 : index
    %c0_23 = arith.constant 0 : index
    %c0_24 = arith.constant 0 : index
    %c18 = arith.constant 18 : index
    %19 = vector.load %arg2[%c0_22, %c0_23, %c0_24, %c18] : memref<1x1x32x384xbf16, #tpu.memory_space<vmem>>, vector<1x1x32x256xbf16>
    %20 = vector.shape_cast %19 : vector<1x1x32x256xbf16> to vector<32x256xbf16>
    %cst_25 = arith.constant dense<0.000000e+00> : vector<64x256xf32>
    %21 = tpu.matmul %18, %20, %cst_25 {dimension_numbers = #tpu.dot_dimension_numbers<[1], [0], [0], [1], [0, 0, 1, 1], [], []>} : vector<64x32xbf16>, vector<32x256xbf16>, vector<64x256xf32> -> vector<64x256xf32>
    %22 = arith.addf %16, %21 : vector<64x256xf32>
    %c4 = arith.constant 4 : index
    %c0_26 = arith.constant 0 : index
    %c0_27 = arith.constant 0 : index
    %23 = vector.load %arg4[%c4, %c0_26, %c0_27] : memref<9x64x32xbf16, #tpu.memory_space<vmem>>, vector<1x64x32xbf16>
    %24 = vector.shape_cast %23 : vector<1x64x32xbf16> to vector<64x32xbf16>
    %c0_28 = arith.constant 0 : index
    %c0_29 = arith.constant 0 : index
    %c0_30 = arith.constant 0 : index
    %c19 = arith.constant 19 : index
    %25 = vector.load %arg2[%c0_28, %c0_29, %c0_30, %c19] : memref<1x1x32x384xbf16, #tpu.memory_space<vmem>>, vector<1x1x32x256xbf16>
    %26 = vector.shape_cast %25 : vector<1x1x32x256xbf16> to vector<32x256xbf16>
    %cst_31 = arith.constant dense<0.000000e+00> : vector<64x256xf32>
    %27 = tpu.matmul %24, %26, %cst_31 {dimension_numbers = #tpu.dot_dimension_numbers<[1], [0], [0], [1], [0, 0, 1, 1], [], []>} : vector<64x32xbf16>, vector<32x256xbf16>, vector<64x256xf32> -> vector<64x256xf32>
    %28 = arith.addf %22, %27 : vector<64x256xf32>
    %c5 = arith.constant 5 : index
    %c0_32 = arith.constant 0 : index
    %c0_33 = arith.constant 0 : index
    %29 = vector.load %arg4[%c5, %c0_32, %c0_33] : memref<9x64x32xbf16, #tpu.memory_space<vmem>>, vector<1x64x32xbf16>
    %30 = vector.shape_cast %29 : vector<1x64x32xbf16> to vector<64x32xbf16>
    %c0_34 = arith.constant 0 : index
    %c0_35 = arith.constant 0 : index
    %c0_36 = arith.constant 0 : index
    %c20 = arith.constant 20 : index
    %31 = vector.load %arg2[%c0_34, %c0_35, %c0_36, %c20] : memref<1x1x32x384xbf16, #tpu.memory_space<vmem>>, vector<1x1x32x256xbf16>
    %32 = vector.shape_cast %31 : vector<1x1x32x256xbf16> to vector<32x256xbf16>
    %cst_37 = arith.constant dense<0.000000e+00> : vector<64x256xf32>
    %33 = tpu.matmul %30, %32, %cst_37 {dimension_numbers = #tpu.dot_dimension_numbers<[1], [0], [0], [1], [0, 0, 1, 1], [], []>} : vector<64x32xbf16>, vector<32x256xbf16>, vector<64x256xf32> -> vector<64x256xf32>
    %34 = arith.addf %28, %33 : vector<64x256xf32>
    %c6 = arith.constant 6 : index
    %c0_38 = arith.constant 0 : index
    %c0_39 = arith.constant 0 : index
    %35 = vector.load %arg4[%c6, %c0_38, %c0_39] : memref<9x64x32xbf16, #tpu.memory_space<vmem>>, vector<1x64x32xbf16>
    %36 = vector.shape_cast %35 : vector<1x64x32xbf16> to vector<64x32xbf16>
    %c0_40 = arith.constant 0 : index
    %c0_41 = arith.constant 0 : index
    %c0_42 = arith.constant 0 : index
    %c36 = arith.constant 36 : index
    %37 = vector.load %arg2[%c0_40, %c0_41, %c0_42, %c36] : memref<1x1x32x384xbf16, #tpu.memory_space<vmem>>, vector<1x1x32x256xbf16>
    %38 = vector.shape_cast %37 : vector<1x1x32x256xbf16> to vector<32x256xbf16>
    %cst_43 = arith.constant dense<0.000000e+00> : vector<64x256xf32>
    %39 = tpu.matmul %36, %38, %cst_43 {dimension_numbers = #tpu.dot_dimension_numbers<[1], [0], [0], [1], [0, 0, 1, 1], [], []>} : vector<64x32xbf16>, vector<32x256xbf16>, vector<64x256xf32> -> vector<64x256xf32>
    %40 = arith.addf %34, %39 : vector<64x256xf32>
    %c7 = arith.constant 7 : index
    %c0_44 = arith.constant 0 : index
    %c0_45 = arith.constant 0 : index
    %41 = vector.load %arg4[%c7, %c0_44, %c0_45] : memref<9x64x32xbf16, #tpu.memory_space<vmem>>, vector<1x64x32xbf16>
    %42 = vector.shape_cast %41 : vector<1x64x32xbf16> to vector<64x32xbf16>
    %c0_46 = arith.constant 0 : index
    %c0_47 = arith.constant 0 : index
    %c0_48 = arith.constant 0 : index
    %c37 = arith.constant 37 : index
    %43 = vector.load %arg2[%c0_46, %c0_47, %c0_48, %c37] : memref<1x1x32x384xbf16, #tpu.memory_space<vmem>>, vector<1x1x32x256xbf16>
    %44 = vector.shape_cast %43 : vector<1x1x32x256xbf16> to vector<32x256xbf16>
    %cst_49 = arith.constant dense<0.000000e+00> : vector<64x256xf32>
    %45 = tpu.matmul %42, %44, %cst_49 {dimension_numbers = #tpu.dot_dimension_numbers<[1], [0], [0], [1], [0, 0, 1, 1], [], []>} : vector<64x32xbf16>, vector<32x256xbf16>, vector<64x256xf32> -> vector<64x256xf32>
    %46 = arith.addf %40, %45 : vector<64x256xf32>
    %c8 = arith.constant 8 : index
    %c0_50 = arith.constant 0 : index
    %c0_51 = arith.constant 0 : index
    %47 = vector.load %arg4[%c8, %c0_50, %c0_51] : memref<9x64x32xbf16, #tpu.memory_space<vmem>>, vector<1x64x32xbf16>
    %48 = vector.shape_cast %47 : vector<1x64x32xbf16> to vector<64x32xbf16>
    %c0_52 = arith.constant 0 : index
    %c0_53 = arith.constant 0 : index
    %c0_54 = arith.constant 0 : index
    %c38 = arith.constant 38 : index
    %49 = vector.load %arg2[%c0_52, %c0_53, %c0_54, %c38] : memref<1x1x32x384xbf16, #tpu.memory_space<vmem>>, vector<1x1x32x256xbf16>
    %50 = vector.shape_cast %49 : vector<1x1x32x256xbf16> to vector<32x256xbf16>
    %cst_55 = arith.constant dense<0.000000e+00> : vector<64x256xf32>
    %51 = tpu.matmul %48, %50, %cst_55 {dimension_numbers = #tpu.dot_dimension_numbers<[1], [0], [0], [1], [0, 0, 1, 1], [], []>} : vector<64x32xbf16>, vector<32x256xbf16>, vector<64x256xf32> -> vector<64x256xf32>
    %52 = arith.addf %46, %51 : vector<64x256xf32>
    %c0_56 = arith.constant 0 : index
    %c0_57 = arith.constant 0 : index
    %53 = vector.load %arg5[%c0_56, %c0_57] : memref<64x1xf32, #tpu.memory_space<vmem>>, vector<64x1xf32>
    %54 = vector.broadcast %53 : vector<64x1xf32> to vector<64x256xf32>
    %55 = arith.addf %52, %54 : vector<64x256xf32>
    %cst_58 = arith.constant 0.000000e+00 : f32
    %56 = vector.broadcast %cst_58 : f32 to vector<64x256xf32>
    %57 = arith.maximumf %55, %56 : vector<64x256xf32>
    %c0_59 = arith.constant 0 : index
    %c0_60 = arith.constant 0 : index
    %58 = vector.load %arg6[%c0_59, %c0_60] : memref<40x64xbf16, #tpu.memory_space<vmem>>, vector<40x64xbf16>
    %59 = arith.truncf %57 : vector<64x256xf32> to vector<64x256xbf16>
    %cst_61 = arith.constant dense<0.000000e+00> : vector<40x256xf32>
    %60 = tpu.matmul %58, %59, %cst_61 {dimension_numbers = #tpu.dot_dimension_numbers<[1], [0], [0], [1], [0, 0, 1, 1], [], []>} : vector<40x64xbf16>, vector<64x256xbf16>, vector<40x256xf32> -> vector<40x256xf32>
    %c0_62 = arith.constant 0 : index
    %c0_63 = arith.constant 0 : index
    %61 = vector.load %arg7[%c0_62, %c0_63] : memref<40x1xf32, #tpu.memory_space<vmem>>, vector<40x1xf32>
    %62 = vector.broadcast %61 : vector<40x1xf32> to vector<40x256xf32>
    %63 = arith.addf %60, %62 : vector<40x256xf32>
    %c0_64 = arith.constant 0 : index
    %c0_65 = arith.constant 0 : index
    %64 = vector.load %arg3[%c0_64, %c0_65] : memref<1x256xf32, #tpu.memory_space<vmem>>, vector<1x256xf32>
    %cst_66 = arith.constant 0.000000e+00 : f32
    %65 = vector.broadcast %cst_66 : f32 to vector<1x256xf32>
    %66 = arith.cmpf ogt, %64, %65 : vector<1x256xf32>
    %67 = tpu.iota {dimensions = array<i32: 0>} : vector<8x1xi32>
    %c4_i32 = arith.constant 4 : i32
    %68 = vector.broadcast %c4_i32 : i32 to vector<8x1xi32>
    %69 = arith.cmpi slt, %67, %68 : vector<8x1xi32>
    %70 = vector.extract_strided_slice %63 {offsets = [0, 0], sizes = [8, 256], strides = [1, 1]} : vector<40x256xf32> to vector<8x256xf32>
    %71 = math.exp %70 : vector<8x256xf32>
    %cst_67 = arith.constant 1.000000e+00 : f32
    %72 = vector.broadcast %cst_67 : f32 to vector<8x256xf32>
    %73 = arith.mulf %71, %72 : vector<8x256xf32>
    %cst_68 = arith.constant 0.000000e+00 : f32
    %74 = vector.shape_cast %69 : vector<8x1xi1> to vector<8x1xi1>
    %75 = vector.broadcast %74 : vector<8x1xi1> to vector<8x256xi1>
    %76 = vector.broadcast %cst_68 : f32 to vector<8x256xf32>
    %77 = arith.select %75, %73, %76 : vector<8x256xi1>, vector<8x256xf32>
    %cst_69 = arith.constant 0.000000e+00 : f32
    %78 = vector.shape_cast %66 : vector<1x256xi1> to vector<1x256xi1>
    %79 = vector.broadcast %78 : vector<1x256xi1> to vector<8x256xi1>
    %80 = vector.broadcast %cst_69 : f32 to vector<8x256xf32>
    %81 = arith.select %79, %77, %80 : vector<8x256xi1>, vector<8x256xf32>
    %c0_70 = arith.constant 0 : index
    %c0_71 = arith.constant 0 : index
    %c0_72 = arith.constant 0 : index
    %82 = vector.load %arg8[%c0_70, %c0_71, %c0_72] : memref<1x40x256xf32, #tpu.memory_space<vmem>>, vector<1x8x256xf32>
    %83 = vector.shape_cast %82 : vector<1x8x256xf32> to vector<8x256xf32>
    %84 = vector.shape_cast %81 : vector<8x256xf32> to vector<1x8x256xf32>
    tpu.vector_store %arg8[%c0_70, %c0_71, %c0_72], %84 {strides = array<i32>} : memref<1x40x256xf32, #tpu.memory_space<vmem>>, vector<1x8x256xf32>,
    %85 = vector.extract_strided_slice %63 {offsets = [8, 0], sizes = [32, 256], strides = [1, 1]} : vector<40x256xf32> to vector<32x256xf32>
    %c0_73 = arith.constant 0 : index
    %c8_74 = arith.constant 8 : index
    %c0_75 = arith.constant 0 : index
    %86 = vector.load %arg8[%c0_73, %c8_74, %c0_75] : memref<1x40x256xf32, #tpu.memory_space<vmem>>, vector<1x32x256xf32>
    %87 = vector.shape_cast %86 : vector<1x32x256xf32> to vector<32x256xf32>
    %88 = vector.shape_cast %85 : vector<32x256xf32> to vector<1x32x256xf32>
    tpu.vector_store %arg8[%c0_73, %c8_74, %c0_75], %88 {strides = array<i32>} : memref<1x40x256xf32, #tpu.memory_space<vmem>>, vector<1x32x256xf32>,
    return
  }
  func.func @transform_0(%arg0: i32, %arg1: i32) -> (i32, i32, i32, i32) {
    %c0_i32 = arith.constant 0 : i32
    %c0_i32_0 = arith.constant 0 : i32
    %c0_i32_1 = arith.constant 0 : i32
    return %arg0, %arg1, %c0_i32, %c0_i32_0 : i32, i32, i32, i32
  }
  func.func @transform_1(%arg0: i32, %arg1: i32) -> (i32, i32) {
    %c0_i32 = arith.constant 0 : i32
    %c0_i32_0 = arith.constant 0 : i32
    return %c0_i32, %arg1 : i32, i32
  }
  func.func @transform_2(%arg0: i32, %arg1: i32) -> (i32, i32, i32) {
    %c0_i32 = arith.constant 0 : i32
    %c0_i32_0 = arith.constant 0 : i32
    %c0_i32_1 = arith.constant 0 : i32
    %c0_i32_2 = arith.constant 0 : i32
    return %c0_i32, %c0_i32_0, %c0_i32_1 : i32, i32, i32
  }
  func.func @transform_3(%arg0: i32, %arg1: i32) -> (i32, i32) {
    %c0_i32 = arith.constant 0 : i32
    %c0_i32_0 = arith.constant 0 : i32
    %c0_i32_1 = arith.constant 0 : i32
    return %c0_i32, %c0_i32_0 : i32, i32
  }
  func.func @transform_4(%arg0: i32, %arg1: i32) -> (i32, i32) {
    %c0_i32 = arith.constant 0 : i32
    %c0_i32_0 = arith.constant 0 : i32
    %c0_i32_1 = arith.constant 0 : i32
    return %c0_i32, %c0_i32_0 : i32, i32
  }
  func.func @transform_5(%arg0: i32, %arg1: i32) -> (i32, i32) {
    %c0_i32 = arith.constant 0 : i32
    %c0_i32_0 = arith.constant 0 : i32
    %c0_i32_1 = arith.constant 0 : i32
    return %c0_i32, %c0_i32_0 : i32, i32
  }
  func.func @transform_6(%arg0: i32, %arg1: i32) -> (i32, i32, i32) {
    %c0_i32 = arith.constant 0 : i32
    %c0_i32_0 = arith.constant 0 : i32
    return %arg0, %c0_i32, %arg1 : i32, i32, i32
  }
}

</mosaic_0001>

<bundles_post_ra>
// kernel: tpu_custom_call.1
= control target key start
LH: loop header
LB: loop body
LE: loop exit
PB: predicated region body
PF: predicated region fallthrough
CT: control target
= control target key end

     0   :  { %11 = vsyncpa [#allocation3], 0  ;;  %s3062_s0 = inlined_call_operand.vmem [shape: bf16[2,2,32,384], index: 0, kind: input, shape index: {}]   ;;  %s3063_s1 = inlined_call_operand.vmem [shape: f32[1,512], index: 1, kind: input, shape index: {}]   ;;  %s3064_s2 = inlined_call_operand.vmem [shape: bf16[9,64,32], index: 2, kind: input, shape index: {}]   ;;  %s3065_s3 = inlined_call_operand.vmem [shape: f32[64,1], index: 3, kind: input, shape index: {}]   ;;  %s3066_s4 = inlined_call_operand.vmem [shape: bf16[40,64], index: 4, kind: input, shape index: {}]   ;;  %s3067_s5 = inlined_call_operand.vmem [shape: f32[40,1], index: 5, kind: input, shape index: {}]   ;;  %s3068_s6 = inlined_call_operand.hbm [shape: f32[2,40,512], index: 6, kind: output, shape index: {}]  }
   0x1   :  { %13 = vsyncpa [#allocation3 + $0x1], 0  ;;  %s2591_s21 = smov 0   ;;  %s2593_s22 = smov 0  }
   0x2   :  { %s2595_s23 = smov 0   ;;  %s2597_s24 = smov 0  }
   0x3   :  { %s2599_s25 = smov 0   ;;  %s2601_s26 = smov 0  }
   0x4   :  { %s2603_s27 = smov 0   ;;  %s2605_s28 = smov 0  }
   0x5 LB: > { %s2016_s29 = sadd.s32 4294967295, %s2541_s28   ;;  %s2017_s30 = sadd.s32 4294967294, %s2541_s28   ;;  %s2541_s28 = sphi %s2605_s28, %s19_s28   ;;  %s2537_s27 = sphi %s2603_s27, %s3080_s27   ;;  %s2533_s26 = sphi %s2601_s26, %s3079_s26   ;;  %s2529_s25 = sphi %s2599_s25, %s3078_s25   ;;  %s2525_s24 = sphi %s2597_s24, %s3077_s24   ;;  %s2521_s23 = sphi %s2595_s23, %s3076_s23   ;;  %s2517_s22 = sphi %s2593_s22, %s3075_s22   ;;  %s2513_s21 = sphi %s2591_s21, %s3074_s21  }
   0x6   : > { %s28_s7 = sadd.s32 1, %s2533_s26  ;;  %s31_s8 = sadd.s32 1, %s2537_s27 }
   0x7   : > { %p29_p0 = scmp.ge.s32.totalorder %s28_s7, 2  ;;  %p188_p1 = scmp.ne.s32.totalorder %s2521_s23, %s2517_s22 }
   0x8   : > { %p189_p2 = scmp.eq.s32.totalorder %s2016_s29, 3  ;;  %p194_p5 = scmp.ne.s32.totalorder %s2517_s22, %s2513_s21 }
   0x9   : > { %s3082_s7 = smov (%p29_p0, %s28_s7), 0  ;;  %s3084_s8 = smov (!%p29_p0, %s31_s8), %s2537_s27 }
   0xa   : > { %s174_s9 = ssub.s32 %s2533_s26, %s3082_s7  ;;  %p2642_p3 = por %p189_p2, %p188_p1 }
   0xb   : > { %p33_p4 = scmp.ge.s32.totalorder %s3084_s8, 2  ;;  %p195_p6 = scmp.eq.s32.totalorder %s2017_s30, 3 }
   0xc   : > { %p2020_p7 = scmp.ge.s32.totalorder %s2541_s28, 1  ;;  %p245_p9 = scmp.lt.s32.totalorder %s2541_s28, 5 }
   0xd   : > { %s3086_s8 = smov (%p33_p4, %s3084_s8), 0  ;;  %p2651_p8 = por %p195_p6, %p194_p5 }
   0xe   : > { %3071 = sst [smem:[#allocation5_spill]] %s3086_s8  ;;  %s173_s12 = ssub.s32 %s2537_s27, %s3086_s8 }
   0xf   : > { %s178_s13 = sadd.s32 1, %s2521_s23  ;;  %s175_s14 = sor.u32 %s174_s9, %s173_s12 }
  0x10   : > { %p246_p10 = pnand %p2020_p7, %p245_p9  ;;  %p176_p11 = scmp.eq.s32.totalorder %s175_s14, 0 }
  0x11   : > { %p283_p12 = scmp.lt.s32.totalorder (!%p246_p10), %s2529_s25, 1  ;;  %p285_p13 = scmp.lt.s32.totalorder (!%p246_p10), %s2525_s24, 1  ;;  %v2544_v4 = vmov (!%p246_p10), 0   ;;  %vm949_vm0 = vcmask (!%p246_p10), 891904   ;;  %v2404_v17 = vld [vmem:[%s3064_s2 + $0x80] sm:$0xff] (!%p246_p10)   ;;  %vm386_vm1 = vcmask (!%p246_p10), 1039360  }
  0x12   : > { %s2660_s15 = scalar_select %p176_p11, %s2521_s23, %s178_s13  }
  0x13   : > { %249 = sbr.rel (%p246_p10) target bundleno = 789 (0x315), region = 44  ;;  %s2543_s12 = smov (!%p246_p10), 109   ;;  %1002 = vmatprep.mubr.bf16.mxu0 (!%p246_p10), %v2544_v4  ;;  %440 = vmatprep.mubr.bf16.mxu1 (!%p246_p10), %v2544_v4  ;;  %vm395_vm2 = vcmask (!%p246_p10), 261120   ;;  %vm1100_vm3 = vcmask (!%p246_p10), 883712   ;;  %v2405_v24 = vld [vmem:[%s3064_s2 + $0x88] sm:$0xff] (!%p246_p10)   ;;  %v2406_v32 = vld [vmem:[%s3064_s2 + $0x90] sm:$0xff] (!%p246_p10)  }
  0x14   : > { %2395 = vset.pattern.permute.xlu1 (!%p246_p10), %v2544_v4  ;;  %2394 = vset.pattern.permute.xlu0 (!%p246_p10), %v2544_v4  ;;  %s2545_s8 = smov (!%p246_p10), 127   ;;  %s2546_s13 = smov (!%p246_p10), 108   ;;  %v2407_v39 = vld [vmem:[%s3064_s2 + $0x20] sm:$0xff] (!%p246_p10)   ;;  %v2408_v41 = vld [vmem:[%s3064_s2 + $0x98] sm:$0xff] (!%p246_p10)   ;;  %vm1251_vm4 = vcmask (!%p246_p10), 752640   ;;  %v1664_v45 = vld [vmem:[%s3065_s3 + $0x8] sm:$0xff] (!%p246_p10) }
  0x15   : > { %s2547_s14 = smov (!%p246_p10), 92   ;;  %v1663_v46 = vld [vmem:[%s3065_s3] sm:$0xff] (!%p246_p10)  ;;  %v2409_v48 = vld [vmem:[%s3064_s2 + $0x28] sm:$0xff] (!%p246_p10)   ;;  %v1665_v50 = vld [vmem:[%s3065_s3 + $0x10] sm:$0xff] (!%p246_p10)  ;;  %vm647_vm5 = vcmask (!%p246_p10), 1031168   ;;  %vm1402_vm6 = vcmask (!%p246_p10), 744448  }
  0x16   : > { %v2410_v51 = vld [vmem:[%s3064_s2 + $0xa0] sm:$0xff] (!%p246_p10)   ;;  %v1666_v52 = vld [vmem:[%s3065_s3 + $0x18] sm:$0xff] (!%p246_p10)  ;;  %v1668_v58 = vld [vmem:[%s3065_s3 + $0x28] sm:$0xff] (!%p246_p10)  ;;  %vm798_vm7 = vcmask (!%p246_p10), 900096   ;;  %vm1553_vm8 = vcmask (!%p246_p10), 736256   ;;  %vm1799_vm9 = vcmask (!%p246_p10), 523264  }
  0x17   : > { %v1667_v57 = vld [vmem:[%s3065_s3 + $0x20] sm:$0xff] (!%p246_p10)  ;;  %v2411_v61 = vld [vmem:[%s3064_s2 + $0x30] sm:$0xff] (!%p246_p10)  }
  0x18   : > { %v1669_v63 = vld [vmem:[%s3065_s3 + $0x30] sm:$0xff] (!%p246_p10) }
  0x1a   : > { %s284_s16 = scalar_select %p283_p12, %s2529_s25, 1 }
  0x1b   : > { %s286_s17 = scalar_select %p285_p13, %s2525_s24, 1 }
  0x1c   : > { %s2309_s18 = smul.u32 24, %s284_s16  ;;  %s2548_s16 = smov 126  }
  0x1d   : > { %s2308_s19 = smul.u32 12, %s286_s17  ;;  %s2549_s17 = smov 91  }
  0x1f   : > { %s289_s20 = sadd.s32 %s2309_s18, %s2308_s19  ;;  %s2550_s18 = smov 110  }
  0x20   : > { %s2021_s29 = sshll.u32 %s289_s20, 2  ;;  %s2551_s19 = smov 90  }
  0x21   : > { %s291_s9 = scalar_lea.vmem %s3062_s0, %s2021_s29  ;;  %s2552_s20 = smov [#allocation2]  }
  0x22   : > { %v2669_v0 = vld [vmem:[%s291_s9 + $0x4] ss:$12 sps:$4 sm:$0xff]   ;;  %v2671_v1 = vld [vmem:[%s291_s9] ss:$12 sps:$4 sm:$0xff]   ;;  %v2399_v2 = vld [vmem:[%s291_s9 + $0x8] ss:$12 sps:$4 sm:$0xff]  }
  0x23   : > { %939 = vrot.lane.b32.xlu0 %v2669_v0, %s2543_s12  ;;  %937 = vrot.lane.b32.xlu1 %v2671_v1, %s2543_s12  ;;  %v2675_v3 = vld [vmem:[%s291_s9 + $0x1c] ss:$12 sps:$4 sm:$0xff]   ;;  %v2402_v5 = vld [vmem:[%s291_s9 + $0x20] ss:$12 sps:$4 sm:$0xff]   ;;  %s2451_s29 = sshll.u32 %s2552_s20, 4  ;;  %s2452_s29 = int_to_ptr.vmem [resolvable:$false] %s2451_s29 }
  0x24   : > { %v2680_v6 = vld [vmem:[%s291_s9 + $0x18] ss:$12 sps:$4 sm:$0xff]   ;;  %s2310_s9 = smul.u32 20, %s2529_s25 }
  0x27   : > { %941 = vrot.lane.b32.xlu0 %v2399_v2, %s2543_s12  ;;  %945 = vrot.lane.b32.xlu1 %v2675_v3, %s2543_s12 }
  0x2b   : > { %947 = vrot.lane.b32.xlu0 %v2402_v5, %s2543_s12  ;;  %943 = vrot.lane.b32.xlu1 %v2680_v6, %s2543_s12 }
  0x2f   : > { %376 = vrot.lane.b32.xlu0 %v2669_v0, %s2545_s8  ;;  %378 = vrot.lane.b32.xlu1 %v2399_v2, %s2545_s8 }
  0x33   : > { %1090 = vrot.lane.b32.xlu0 %v2669_v0, %s2546_s13  ;;  %1092 = vrot.lane.b32.xlu1 %v2399_v2, %s2546_s13 }
  0x37   : > { %374 = vrot.lane.b32.xlu0 %v2671_v1, %s2545_s8  ;;  %1088 = vrot.lane.b32.xlu1 %v2671_v1, %s2546_s13 }
  0x3b   : > { %382 = vrot.lane.b32.xlu0 %v2675_v3, %s2545_s8  ;;  %384 = vrot.lane.b32.xlu1 %v2402_v5, %s2545_s8 }
  0x3f   : > { %1096 = vrot.lane.b32.xlu0 %v2675_v3, %s2546_s13  ;;  %1098 = vrot.lane.b32.xlu1 %v2402_v5, %s2546_s13 }
  0x43   : > { %380 = vrot.lane.b32.xlu0 %v2680_v6, %s2545_s8  ;;  %1094 = vrot.lane.b32.xlu1 %v2680_v6, %s2546_s13 }
  0x47   : > { %1241 = vrot.lane.b32.xlu0 %v2669_v0, %s2547_s14  ;;  %1243 = vrot.lane.b32.xlu1 %v2399_v2, %s2547_s14 }
  0x4b   : > { %1239 = vrot.lane.b32.xlu0 %v2671_v1, %s2547_s14  ;;  %1247 = vrot.lane.b32.xlu1 %v2675_v3, %s2547_s14 }
  0x4f   : > { %1249 = vrot.lane.b32.xlu0 %v2402_v5, %s2547_s14  ;;  %1245 = vrot.lane.b32.xlu1 %v2680_v6, %s2547_s14 }
  0x53   : > { %637 = vrot.lane.b32.xlu0 %v2669_v0, %s2548_s16  ;;  %639 = vrot.lane.b32.xlu1 %v2399_v2, %s2548_s16 }
  0x57   : > { %1392 = vrot.lane.b32.xlu0 %v2669_v0, %s2549_s17  ;;  %1394 = vrot.lane.b32.xlu1 %v2399_v2, %s2549_s17 }
  0x5b   : > { %635 = vrot.lane.b32.xlu0 %v2671_v1, %s2548_s16  ;;  %1390 = vrot.lane.b32.xlu1 %v2671_v1, %s2549_s17 }
  0x5f   : > { %643 = vrot.lane.b32.xlu0 %v2675_v3, %s2548_s16  ;;  %645 = vrot.lane.b32.xlu1 %v2402_v5, %s2548_s16 }
  0x63   : > { %1398 = vrot.lane.b32.xlu0 %v2675_v3, %s2549_s17  ;;  %1400 = vrot.lane.b32.xlu1 %v2402_v5, %s2549_s17 }
  0x67   : > { %641 = vrot.lane.b32.xlu0 %v2680_v6, %s2548_s16  ;;  %1396 = vrot.lane.b32.xlu1 %v2680_v6, %s2549_s17  ;;  %s2975_s16 = sshll.u32 %s2525_s24, 1 }
  0x68   : > { %p293_p0 = scmp.lt.s32.totalorder %s2975_s16, 3  ;;  %s1919_s12 = sadd.s32 %s2310_s9, %s2975_s16 }
  0x69   : > { %s2176_s25 = sshll.u32 %s1919_s12, 7 }
  0x6a   : > { %s294_s17 = scalar_select %p293_p0, %s2975_s16, 3 }
  0x6b   : > { %788 = vrot.lane.b32.xlu0 %v2669_v0, %s2550_s18  ;;  %790 = vrot.lane.b32.xlu1 %v2399_v2, %s2550_s18  ;;  %s3000_s16 = scalar_lea.hbm %s3068_s6, %s2176_s25 }
  0x6c   : > { %s295_s30 = scalar_lea.vmem %s3063_s1, %s294_s17 }
  0x6f   : > { %1543 = vrot.lane.b32.xlu0 %v2669_v0, %s2551_s19  ;;  %1545 = vrot.lane.b32.xlu1 %v2399_v2, %s2551_s19  ;;  %v1670_v2 = vld [vmem:[%s3065_s3 + $0x38] sm:$0xff] }
  0x73   : > { %786 = vrot.lane.b32.xlu0 %v2671_v1, %s2550_s18  ;;  %1541 = vrot.lane.b32.xlu1 %v2671_v1, %s2551_s19 }
  0x77   : > { %794 = vrot.lane.b32.xlu0 %v2675_v3, %s2550_s18  ;;  %796 = vrot.lane.b32.xlu1 %v2402_v5, %s2550_s18 }
  0x7b   : > { %1549 = vrot.lane.b32.xlu0 %v2675_v3, %s2551_s19  ;;  %1551 = vrot.lane.b32.xlu1 %v2402_v5, %s2551_s19 }
  0x7f   : > { %792 = vrot.lane.b32.xlu0 %v2680_v6, %s2550_s18  ;;  %1547 = vrot.lane.b32.xlu1 %v2680_v6, %s2551_s19  ;;  %s280_s18 = sand.u32 1, %s2517_s22  }
  0x80   : > { %s2307_s19 = smul.u32 80, %s280_s18  ;;  %s3010_s17 = scalar_lea.sflag [#allocation3], %s280_s18 }
  0x82   : > { %s2985_s24 = scalar_lea.vmem [#allocation2], %s2307_s19 }
  0x83   : > { %1678 = vperm.xlu1 %2395, %v1664_v45   ;;  %1673 = vperm.xlu0 %2394, %v1663_v46   ;;  %v2423_v46 = vld [vmem:[%s3064_s2 + $0x40] sm:$0xff]   ;;  %s1922_s8 = sshll.u32 %s2985_s24, 4  ;;  %s3002_s8 = int_to_ptr.vmem [resolvable:$true] %s1922_s8 }
  0x84   : > { %s2447_s19 = scalar_lea.vmem %s3002_s8, 1280  ;;  %p2454_p5 = scmp.lt.s32.totalorder %s3002_s8, %s2452_s29 }
  0x85   : > { %p2448_p1 = scmp.ne.s32.totalorder %s3002_s8, %s2447_s19 }
  0x87   : > { %1683 = vperm.xlu1 %2395, %v1665_v50   ;;  %1688 = vperm.xlu0 %2394, %v1666_v52   ;;  %p2449_p2 = pnand %p2448_p1, %p2642_p3 }
  0x89   : > { %p2450_p4 = pneg %p2449_p2 }
  0x8b   : > { %1693 = vperm.xlu1 %2395, %v1667_v57   ;;  %1698 = vperm.xlu0 %2394, %v1668_v58  }
  0x8f   : > { %1703 = vperm.xlu1 %2395, %v1669_v63   ;;  %1708 = vperm.xlu0 %2394, %v1670_v2   ;;  %v2430_v63 = vld [vmem:[%s3064_s2 + $0xf0] sm:$0xff]   ;;  %v2433_v2 = vld [vmem:[%s3064_s2 + $0x68] sm:$0xff]  }
  0x95   : > { %v940_v7 = vpop.permute.xlu0 %939  ;;  %v938_v8 = vpop.permute.xlu1 %937 }
  0x96   : > { %v950_v12 = vsel %vm949_vm0, %v938_v8, %v940_v7  ;;  %v1757_v8 = vld [vmem:[%s3067_s5 + $0x8] sm:$0xff] }
  0x97   : > { %1768 = vperm.xlu0 %2394, %v1757_v8   ;;  %v2438_v8 = vld [vmem:[%s3064_s2 + $0x110] sm:$0xff]  }
  0x99   : > { %v942_v9 = vpop.permute.xlu0 %941  ;;  %v946_v10 = vpop.permute.xlu1 %945 }
  0x9a   : > { %v951_v11 = vsel %vm949_vm0, %v940_v7, %v942_v9 }
  0x9b   : > { %970 = vmatprep.subr.bf16.mxu0 %v951_v11 }
  0x9c   : > { %971 = vmatpush1.bf16.msra.mxu0 %v950_v12  ;;  %v1758_v12 = vld [vmem:[%s3067_s5 + $0x10] sm:$0xff] }
  0x9d   : > { %v948_v13 = vpop.permute.xlu0 %947  ;;  %v944_v14 = vpop.permute.xlu1 %943 }
  0x9e   : > { %v953_v15 = vsel %vm949_vm0, %v946_v10, %v948_v13  ;;  %v952_v16 = vsel %vm949_vm0, %v944_v14, %v946_v10  ;;  %v2413_v10 = vld [vmem:[%s3064_s2 + $0x38] sm:$0xff]   ;;  %v2414_v13 = vld [vmem:[%s3064_s2 + $0xb0] sm:$0xff]  }
  0x9f   : > { %972 = vmatprep.subr.bf16.mxu0 %v953_v15  ;;  %v1759_v14 = vld [vmem:[%s3067_s5 + $0x18] sm:$0xff] }
  0xa0   : > { %973 = vmatpush1.bf16.msra.mxu0 %v952_v16  ;;  %1778 = vperm.xlu0 %2394, %v1759_v14  }
  0xa1   : > { %v377_v18 = vpop.permute.xlu0 %376  ;;  %v379_v19 = vpop.permute.xlu1 %378 }
  0xa2   : > { %v388_v20 = vsel %vm386_vm1, %v377_v18, %v379_v19  ;;  %v2415_v19 = vld [vmem:[%s3064_s2] sm:$0xff]  }
  0xa3   : > { %2101 = vmatmul.mubr.msk.bf16.vlgmr.msra.gmra.mrb[0].mxu0 %vm395_vm2, %v2404_v17  ;;  %408 = vmatprep.subr.bf16.mxu1 %v388_v20  ;;  %v1760_v17 = vld [vmem:[%s3067_s5 + $0x20] sm:$0xff] }
  0xa4   : > { %1012 = vmatprep.mubr.bf16.mxu0 %v2544_v4 }
  0xa5   : > { %v1091_v21 = vpop.permute.xlu0 %1090  ;;  %v1093_v22 = vpop.permute.xlu1 %1092 }
  0xa6   : > { %v1102_v23 = vsel %vm1100_vm3, %v1091_v21, %v1093_v22 }
  0xa7   : > { %1121 = vmatprep.subr.bf16.mxu0 %v1102_v23 }
  0xa9   : > { %v375_v25 = vpop.permute.xlu0 %374  ;;  %v1089_v26 = vpop.permute.xlu1 %1088 }
  0xaa   : > { %v387_v27 = vsel %vm386_vm1, %v375_v25, %v377_v18  ;;  %v1101_v28 = vsel %vm1100_vm3, %v1089_v26, %v1091_v21  ;;  %v2416_v21 = vld [vmem:[%s3064_s2 + $0xb8] sm:$0xff]  }
  0xab   : > { %409 = vmatpush1.bf16.msra.mxu1 %v387_v27  ;;  %2102 = vmatmul.mubr.msk.bf16.gmra.mrb[4].mxu0 %vm395_vm2, %v2405_v24 }
  0xac   : > { %1122 = vmatpush1.bf16.msra.mxu0 %v1101_v28  ;;  %1022 = vmatprep.mubr.bf16.mxu0 %v2544_v4  ;;  %v2417_v28 = vld [vmem:[%s3064_s2 + $0x8] sm:$0xff]  }
  0xad   : > { %v383_v29 = vpop.permute.xlu0 %382  ;;  %v385_v30 = vpop.permute.xlu1 %384 }
  0xae   : > { %v390_v31 = vsel %vm386_vm1, %v383_v29, %v385_v30  ;;  %v2418_v30 = vld [vmem:[%s3064_s2 + $0xc0] sm:$0xff]  }
  0xaf   : > { %410 = vmatprep.subr.bf16.mxu1 %v390_v31 }
  0xb1   : > { %v1097_v33 = vpop.permute.xlu0 %1096  ;;  %v1099_v34 = vpop.permute.xlu1 %1098 }
  0xb2   : > { %v1104_v35 = vsel %vm1100_vm3, %v1097_v33, %v1099_v34 }
  0xb3   : > { %2103 = vmatmul.mubr.msk.bf16.gmra.mrb[8].mxu0 %vm395_vm2, %v2406_v32  ;;  %1123 = vmatprep.subr.bf16.mxu0 %v1104_v35 }
  0xb4   : > { %1032 = vmatprep.mubr.bf16.mxu0 %v2544_v4 }
  0xb5   : > { %v381_v36 = vpop.permute.xlu0 %380  ;;  %v1095_v38 = vpop.permute.xlu1 %1094 }
  0xb6   : > { %v389_v37 = vsel %vm386_vm1, %v381_v36, %v383_v29  ;;  %v1103_v40 = vsel %vm1100_vm3, %v1095_v38, %v1097_v33 }
  0xb7   : > { %411 = vmatpush1.bf16.msra.mxu1 %v389_v37  ;;  %1124 = vmatpush1.bf16.msra.mxu0 %v1103_v40  ;;  %v2419_v37 = vld [vmem:[%s3064_s2 + $0x10] sm:$0xff]  }
  0xb8   : > { %533 = vmatprep.subr.bf16.mxu1 %v2669_v0  ;;  %v2412_v0 = vld [vmem:[%s3064_s2 + $0xa8] sm:$0xff]  }
  0xb9   : > { %v1242_v42 = vpop.permute.xlu0 %1241  ;;  %v1244_v43 = vpop.permute.xlu1 %1243 }
  0xba   : > { %2041 = vmatmul.mubr.msk.bf16.vlgmr.msra.gmra.mrb[0].mxu1 %vm395_vm2, %v2407_v39  ;;  %v1253_v44 = vsel %vm1251_vm4, %v1242_v42, %v1244_v43  ;;  %v2420_v39 = vld [vmem:[%s3064_s2 + $0xc8] sm:$0xff]   ;;  %v2422_v43 = vld [vmem:[%s3064_s2 + $0xd0] sm:$0xff]  }
  0xbb   : > { %2104 = vmatmul.mubr.msk.bf16.gmra.mrb[12].mxu0 %vm395_vm2, %v2408_v41  ;;  %450 = vmatprep.mubr.bf16.mxu1 %v2544_v4  ;;  %v2421_v41 = vld [vmem:[%s3064_s2 + $0x18] sm:$0xff]  }
  0xbc   : > { %1153 = vmatprep.mubr.bf16.mxu0 %v2544_v4  ;;  %1272 = vmatprep.subr.bf16.mxu0 %v1253_v44 }
  0xbd   : > { %v1240_v47 = vpop.permute.xlu0 %1239  ;;  %534 = vmatpush1.bf16.msra.mxu1 %v2671_v1  ;;  %v1248_v49 = vpop.permute.xlu1 %1247 }
  0xbe   : > { %535 = vmatprep.subr.bf16.mxu1 %v2675_v3  ;;  %v1252_v53 = vsel %vm1251_vm4, %v1240_v47, %v1242_v42 }
  0xc1   : > { %v1250_v54 = vpop.permute.xlu0 %1249  ;;  %536 = vmatpush1.bf16.msra.mxu1 %v2680_v6  ;;  %v1246_v55 = vpop.permute.xlu1 %1245  ;;  %v1756_v6 = vld [vmem:[%s3067_s5] sm:$0xff] }
  0xc2   : > { %2042 = vmatmul.mubr.msk.bf16.gmra.mrb[4].mxu1 %vm395_vm2, %v2409_v48  ;;  %v1255_v56 = vsel %vm1251_vm4, %v1248_v49, %v1250_v54  ;;  %v1254_v59 = vsel %vm1251_vm4, %v1246_v55, %v1248_v49  ;;  %1763 = vperm.xlu1 %2395, %v1756_v6   ;;  %v2424_v48 = vld [vmem:[%s3064_s2 + $0xd8] sm:$0xff]   ;;  %v2425_v54 = vld [vmem:[%s3064_s2 + $0x48] sm:$0xff]   ;;  %v2426_v55 = vld [vmem:[%s3064_s2 + $0xe0] sm:$0xff]  }
  0xc3   : > { %2117 = vmatmul.mubr.msk.bf16.vlgmr.msra.gmra.mrb[0].mxu0 %vm395_vm2, %v2410_v51  ;;  %460 = vmatprep.mubr.bf16.mxu1 %v2544_v4  ;;  %v2436_v6 = vld [vmem:[%s3064_s2 + $0x108] sm:$0xff]  }
  0xc4   : > { %1273 = vmatpush1.bf16.msra.mxu0 %v1252_v53  ;;  %1163 = vmatprep.mubr.bf16.mxu0 %v2544_v4 }
  0xc5   : > { %1274 = vmatprep.subr.bf16.mxu0 %v1255_v56  ;;  %v638_v60 = vpop.permute.xlu0 %637  ;;  %v640_v62 = vpop.permute.xlu1 %639 }
  0xc6   : > { %v649_v1 = vsel %vm647_vm5, %v638_v60, %v640_v62  ;;  %1773 = vperm.xlu1 %2395, %v1758_v12   ;;  %v2429_v62 = vld [vmem:[%s3064_s2 + $0x58] sm:$0xff]  }
  0xc7   : > { %668 = vmatprep.subr.bf16.mxu1 %v649_v1  ;;  %v2432_v1 = vld [vmem:[%s3064_s2 + $0xf8] sm:$0xff]  }
  0xc8   : > { %1275 = vmatpush1.bf16.msra.mxu0 %v1254_v59 }
  0xc9   : > { %v1393_v3 = vpop.permute.xlu0 %1392  ;;  %v1395_v5 = vpop.permute.xlu1 %1394 }
  0xca   : > { %2043 = vmatmul.mubr.msk.bf16.gmra.mrb[8].mxu1 %vm395_vm2, %v2411_v61  ;;  %v1404_v7 = vsel %vm1402_vm6, %v1393_v3, %v1395_v5  ;;  %1783 = vperm.xlu1 %2395, %v1760_v17   ;;  %v2428_v61 = vld [vmem:[%s3064_s2 + $0xe8] sm:$0xff]   ;;  %v2435_v5 = vld [vmem:[%s3064_s2 + $0x70] sm:$0xff]  }
  0xcb   : > { %2118 = vmatmul.mubr.msk.bf16.gmra.mrb[4].mxu0 %vm395_vm2, %v2412_v0  ;;  %470 = vmatprep.mubr.bf16.mxu1 %v2544_v4  ;;  %v2431_v0 = vld [vmem:[%s3064_s2 + $0x60] sm:$0xff]  }
  0xcc   : > { %1173 = vmatprep.mubr.bf16.mxu0 %v2544_v4  ;;  %1423 = vmatprep.subr.bf16.mxu0 %v1404_v7  ;;  %v2437_v7 = vld [vmem:[%s3064_s2 + $0x78] sm:$0xff]  }
  0xcd   : > { %v636_v9 = vpop.permute.xlu0 %635  ;;  %v1391_v11 = vpop.permute.xlu1 %1390 }
  0xce   : > { %v648_v22 = vsel %vm647_vm5, %v636_v9, %v638_v60  ;;  %v1403_v32 = vsel %vm1402_vm6, %v1391_v11, %v1393_v3  ;;  %v2427_v60 = vld [vmem:[%s3064_s2 + $0x50] sm:$0xff]   ;;  %v2434_v3 = vld [vmem:[%s3064_s2 + $0x100] sm:$0xff]   ;;  %v2439_v9 = vld [vmem:[%s3064_s2 + $0x118] sm:$0xff]  }
  0xd1   : > { %v644_v15 = vpop.permute.xlu0 %643  ;;  %v646_v16 = vpop.permute.xlu1 %645 }
  0xd2   : > { %2044 = vmatmul.mubr.msk.bf16.gmra.mrb[12].mxu1 %vm395_vm2, %v2413_v10  ;;  %v651_v24 = vsel %vm647_vm5, %v644_v15, %v646_v16 }
  0xd3   : > { %2119 = vmatmul.mubr.msk.bf16.gmra.mrb[8].mxu0 %vm395_vm2, %v2414_v13  ;;  %565 = vmatprep.mubr.bf16.mxu1 %v2544_v4 }
  0xd4   : > { %1183 = vmatprep.mubr.bf16.mxu0 %v2544_v4 }
  0xd5   : > { %v1399_v18 = vpop.permute.xlu0 %1398  ;;  %v1401_v20 = vpop.permute.xlu1 %1400 }
  0xd6   : > { %v1406_v33 = vsel %vm1402_vm6, %v1399_v18, %v1401_v20 }
  0xd9   : > { %v642_v23 = vpop.permute.xlu0 %641  ;;  %v1397_v25 = vpop.permute.xlu1 %1396 }
  0xda   : > { %2053 = vmatmul.mubr.msk.bf16.vlgmr.msra.gmra.mrb[0].mxu1 %vm395_vm2, %v2415_v19  ;;  %v650_v26 = vsel %vm647_vm5, %v642_v23, %v644_v15  ;;  %v1405_v35 = vsel %vm1402_vm6, %v1397_v25, %v1399_v18 }
  0xdb   : > { %2120 = vmatmul.mubr.msk.bf16.gmra.mrb[12].mxu0 %vm395_vm2, %v2416_v21  ;;  %575 = vmatprep.mubr.bf16.mxu1 %v2544_v4 }
  0xdc   : > { %1304 = vmatprep.mubr.bf16.mxu0 %v2544_v4  ;;  %669 = vmatpush1.bf16.msra.mxu1 %v648_v22 }
  0xdd   : > { %670 = vmatprep.subr.bf16.mxu1 %v651_v24  ;;  %v789_v27 = vpop.permute.xlu0 %788  ;;  %v791_v29 = vpop.permute.xlu1 %790 }
  0xde   : > { %v800_v31 = vsel %vm798_vm7, %v789_v27, %v791_v29 }
  0xe0   : > { %671 = vmatpush1.bf16.msra.mxu1 %v650_v26 }
  0xe1   : > { %819 = vmatprep.subr.bf16.mxu1 %v800_v31  ;;  %v1544_v34 = vpop.permute.xlu0 %1543  ;;  %v1546_v36 = vpop.permute.xlu1 %1545 }
  0xe2   : > { %2054 = vmatmul.mubr.msk.bf16.gmra.mrb[4].mxu1 %vm395_vm2, %v2417_v28  ;;  %v1555_v38 = vsel %vm1553_vm8, %v1544_v34, %v1546_v36 }
  0xe3   : > { %2133 = vmatmul.mubr.msk.bf16.vlgmr.msra.gmra.mrb[0].mxu0 %vm395_vm2, %v2418_v30  ;;  %585 = vmatprep.mubr.bf16.mxu1 %v2544_v4 }
  0xe4   : > { %1424 = vmatpush1.bf16.msra.mxu0 %v1403_v32  ;;  %1314 = vmatprep.mubr.bf16.mxu0 %v2544_v4 }
  0xe5   : > { %1425 = vmatprep.subr.bf16.mxu0 %v1406_v33  ;;  %v787_v40 = vpop.permute.xlu0 %786  ;;  %v1542_v44 = vpop.permute.xlu1 %1541 }
  0xe6   : > { %v799_v49 = vsel %vm798_vm7, %v787_v40, %v789_v27  ;;  %v1554_v56 = vsel %vm1553_vm8, %v1542_v44, %v1544_v34 }
  0xe8   : > { %1426 = vmatpush1.bf16.msra.mxu0 %v1405_v35 }
  0xe9   : > { %1574 = vmatprep.subr.bf16.mxu0 %v1555_v38  ;;  %v795_v42 = vpop.permute.xlu0 %794  ;;  %v797_v47 = vpop.permute.xlu1 %796 }
  0xea   : > { %2055 = vmatmul.mubr.msk.bf16.gmra.mrb[8].mxu1 %vm395_vm2, %v2419_v37  ;;  %v802_v51 = vsel %vm798_vm7, %v795_v42, %v797_v47 }
  0xeb   : > { %2134 = vmatmul.mubr.msk.bf16.gmra.mrb[4].mxu0 %vm395_vm2, %v2420_v39  ;;  %595 = vmatprep.mubr.bf16.mxu1 %v2544_v4 }
  0xec   : > { %1324 = vmatprep.mubr.bf16.mxu0 %v2544_v4 }
  0xed   : > { %v1550_v45 = vpop.permute.xlu0 %1549  ;;  %v1552_v52 = vpop.permute.xlu1 %1551 }
  0xee   : > { %v1557_v58 = vsel %vm1553_vm8, %v1550_v45, %v1552_v52 }
  0xf1   : > { %v793_v50 = vpop.permute.xlu0 %792  ;;  %v1548_v57 = vpop.permute.xlu1 %1547 }
  0xf2   : > { %2056 = vmatmul.mubr.msk.bf16.gmra.mrb[12].mxu1 %vm395_vm2, %v2421_v41  ;;  %v801_v53 = vsel %vm798_vm7, %v793_v50, %v795_v42  ;;  %v1556_v59 = vsel %vm1553_vm8, %v1548_v57, %v1550_v45 }
  0xf3   : > { %2135 = vmatmul.mubr.msk.bf16.gmra.mrb[8].mxu0 %vm395_vm2, %v2422_v43  ;;  %700 = vmatprep.mubr.bf16.mxu1 %v2544_v4 }
  0xf4   : > { %1334 = vmatprep.mubr.bf16.mxu0 %v2544_v4 }
  0xfa   : > { %2069 = vmatmul.mubr.msk.bf16.vlgmr.msra.gmra.mrb[0].mxu1 %vm395_vm2, %v2423_v46 }
  0xfb   : > { %2136 = vmatmul.mubr.msk.bf16.gmra.mrb[12].mxu0 %vm395_vm2, %v2424_v48  ;;  %710 = vmatprep.mubr.bf16.mxu1 %v2544_v4 }
  0xfc   : > { %1455 = vmatprep.mubr.bf16.mxu0 %v2544_v4  ;;  %820 = vmatpush1.bf16.msra.mxu1 %v799_v49 }
  0xfd   : > { %821 = vmatprep.subr.bf16.mxu1 %v802_v51 }
 0x100   : > { %822 = vmatpush1.bf16.msra.mxu1 %v801_v53 }
 0x102   : > { %2070 = vmatmul.mubr.msk.bf16.gmra.mrb[4].mxu1 %vm395_vm2, %v2425_v54  ;;  %v1679_v14 = vpop.permute.xlu1 %1678  ;;  %v1674_v15 = vpop.permute.xlu0 %1673 }
 0x103   : > { %2149 = vmatmul.mubr.msk.bf16.vlgmr.msra.gmra.mrb[0].mxu0 %vm395_vm2, %v2426_v55  ;;  %720 = vmatprep.mubr.bf16.mxu1 %v2544_v4 }
 0x104   : > { %1575 = vmatpush1.bf16.msra.mxu0 %v1554_v56  ;;  %1465 = vmatprep.mubr.bf16.mxu0 %v2544_v4 }
 0x105   : > { %1576 = vmatprep.subr.bf16.mxu0 %v1557_v58 }
 0x106   : > { %v1684_v32 = vpop.permute.xlu1 %1683  ;;  %v1689_v51 = vpop.permute.xlu0 %1688 }
 0x108   : > { %1577 = vmatpush1.bf16.msra.mxu0 %v1556_v59 }
 0x10a   : > { %2071 = vmatmul.mubr.msk.bf16.gmra.mrb[8].mxu1 %vm395_vm2, %v2427_v60  ;;  %v1694_v56 = vpop.permute.xlu1 %1693 }
 0x10b   : > { %2150 = vmatmul.mubr.msk.bf16.gmra.mrb[4].mxu0 %vm395_vm2, %v2428_v61  ;;  %730 = vmatprep.mubr.bf16.mxu1 %v2544_v4 }
 0x10c   : > { %1475 = vmatprep.mubr.bf16.mxu0 %v2544_v4 }
 0x112   : > { %2072 = vmatmul.mubr.msk.bf16.gmra.mrb[12].mxu1 %vm395_vm2, %v2429_v62 }
 0x113   : > { %2151 = vmatmul.mubr.msk.bf16.gmra.mrb[8].mxu0 %vm395_vm2, %v2430_v63  ;;  %851 = vmatprep.mubr.bf16.mxu1 %v2544_v4 }
 0x114   : > { %1485 = vmatprep.mubr.bf16.mxu0 %v2544_v4 }
 0x11a   : > { %2085 = vmatmul.mubr.msk.bf16.vlgmr.msra.gmra.mrb[0].mxu1 %vm395_vm2, %v2431_v0 }
 0x11b   : > { %2152 = vmatmul.mubr.msk.bf16.gmra.mrb[12].mxu0 %vm395_vm2, %v2432_v1  ;;  %861 = vmatprep.mubr.bf16.mxu1 %v2544_v4 }
 0x11c   : > { %1606 = vmatprep.mubr.bf16.mxu0 %v2544_v4 }
 0x122   : > { %2086 = vmatmul.mubr.msk.bf16.gmra.mrb[4].mxu1 %vm395_vm2, %v2433_v2 }
 0x123   : > { %2165 = vmatmul.mubr.msk.bf16.vlgmr.msra.gmra.mrb[0].mxu0 %vm395_vm2, %v2434_v3  ;;  %871 = vmatprep.mubr.bf16.mxu1 %v2544_v4 }
 0x124   : > { %1616 = vmatprep.mubr.bf16.mxu0 %v2544_v4 }
 0x12a   : > { %2087 = vmatmul.mubr.msk.bf16.gmra.mrb[8].mxu1 %vm395_vm2, %v2435_v5 }
 0x12b   : > { %2166 = vmatmul.mubr.msk.bf16.gmra.mrb[4].mxu0 %vm395_vm2, %v2436_v6  ;;  %881 = vmatprep.mubr.bf16.mxu1 %v2544_v4 }
 0x12c   : > { %1626 = vmatprep.mubr.bf16.mxu0 %v2544_v4 }
 0x132   : > { %2088 = vmatmul.mubr.msk.bf16.gmra.mrb[12].mxu1 %vm395_vm2, %v2437_v7 }
 0x133   : > { %2167 = vmatmul.mubr.msk.bf16.gmra.mrb[8].mxu0 %vm395_vm2, %v2438_v8  ;;  %1841 = vmatprep.mubr.bf16.mxu1 %v2544_v4 }
 0x134   : > { %1636 = vmatprep.mubr.bf16.mxu0 %v2544_v4 }
 0x13b   : > { %2168 = vmatmul.mubr.msk.bf16.gmra.mrb[12].mxu0 %vm395_vm2, %v2439_v9 }
 0x1ed   : > { %v853_v10 = vpop.f32.mrb[0].mxu1 }
 0x1ee   : > { %v855_v11 = vpop.f32.mrb[1].mxu1 }
 0x1ef   : > { %v857_v12 = vpop.f32.mrb[2].mxu1 }
 0x1f0   : > { %v859_v13 = vpop.f32.mrb[3].mxu1 }
 0x1f5   : > { %v863_v16 = vpop.f32.mrb[4].mxu1 }
 0x1f6   : > { %v1608_v17 = vpop.f32.mrb[0].mxu0  ;;  %v865_v18 = vpop.f32.mrb[5].mxu1 }
 0x1f7   : > { %v2179_v19 = vadd.f32 %v1608_v17, %v853_v10  ;;  %v867_v20 = vpop.f32.mrb[6].mxu1  ;;  %v1610_v21 = vpop.f32.mrb[1].mxu0 }
 0x1f8   : > { %v2180_v22 = vadd.f32 %v1610_v21, %v855_v11  ;;  %v869_v23 = vpop.f32.mrb[7].mxu1  ;;  %v1612_v24 = vpop.f32.mrb[2].mxu0 }
 0x1f9   : > { %v1711_v25 = vadd.f32 %v2179_v19, %v1674_v15  ;;  %v2181_v26 = vadd.f32 %v1612_v24, %v857_v12  ;;  %v1614_v27 = vpop.f32.mrb[3].mxu0  ;;  %v1699_v12 = vpop.permute.xlu0 %1698 }
 0x1fa   : > { %v1712_v28 = vadd.f32 %v2180_v22, %v1674_v15  ;;  %v2182_v29 = vadd.f32 %v1614_v27, %v859_v13 }
 0x1fb   : > { %v1713_v30 = vadd.f32 %v2181_v26, %v1679_v14  ;;  %v1727_v33 = vmax.f32 %v1711_v25, 0.0  ;;  %v1704_v25 = vpop.permute.xlu1 %1703 }
 0x1fc   : > { %v1714_v31 = vadd.f32 %v2182_v29, %v1679_v14  ;;  %v1728_v36 = vmax.f32 %v1712_v28, 0.0 }
 0x1fd   : > { %v1729_v34 = vmax.f32 %v1713_v30, 0.0  ;;  %v873_v35 = vpop.f32.mrb[8].mxu1 }
 0x1fe   : > { %v1730_v37 = vmax.f32 %v1714_v31, 0.0  ;;  %v1618_v38 = vpop.f32.mrb[4].mxu0  ;;  %v875_v39 = vpop.f32.mrb[9].mxu1 }
 0x1ff   : > { %v1748_v40 = vpack.c.bf16 %v1729_v34, %v1727_v33  ;;  %v2183_v41 = vadd.f32 %v1618_v38, %v863_v16  ;;  %v877_v42 = vpop.f32.mrb[10].mxu1  ;;  %v1620_v43 = vpop.f32.mrb[5].mxu0 }
 0x200   : > { %v2184_v44 = vadd.f32 %v1620_v43, %v865_v18  ;;  %v879_v45 = vpop.f32.mrb[11].mxu1  ;;  %v1622_v46 = vpop.f32.mrb[6].mxu0  ;;  %v1749_v47 = vpack.c.bf16 %v1730_v37, %v1728_v36  ;;  %v2440_v43 = vld [vmem:[%s3066_s4] sm:$0xff]  }
 0x201   : > { %v1715_v48 = vadd.f32 %v2183_v41, %v1684_v32  ;;  %v2185_v49 = vadd.f32 %v1622_v46, %v867_v20  ;;  %v1624_v50 = vpop.f32.mrb[7].mxu0  ;;  %v1872_v46 = vlaneseq }
 0x202   : > { %v1716_v52 = vadd.f32 %v2184_v44, %v1684_v32  ;;  %v2186_v53 = vadd.f32 %v1624_v50, %v869_v23  ;;  %1809 = vmatprep.subr.bf16.mxu1 %v1749_v47  ;;  %v1709_v32 = vpop.permute.xlu0 %1708  ;;  %v2441_v44 = vld [vmem:[%s3066_s4 + $0x8] sm:$0xff]   ;;  %v1764_v47 = vpop.permute.xlu1 %1763  ;;  %v1870_v50 = vld [vmem:[%s295_s30] sm:$0x3]  ;;  %s2453_s30 = scalar_lea.vmem %s2452_s29, 2560 }
 0x203   : > { %v1717_v54 = vadd.f32 %v2185_v49, %v1689_v51  ;;  %1810 = vmatpush1.bf16.msra.mxu1 %v1748_v40  ;;  %v1731_v57 = vmax.f32 %v1715_v48, 0.0  ;;  %vm1871_vm10 = vcmp.gt.f32.partialorder %v1870_v50, 0.0  ;;  %p2455_p6 = scmp.lt.s32.totalorder %s2453_s30, %s2447_s19 }
 0x204   : > { %v1718_v55 = vadd.f32 %v2186_v53, %v1689_v51  ;;  %v1732_v60 = vmax.f32 %v1716_v52, 0.0  ;;  %v1873_v53 = vshrl.u32 %v1872_v46, 7 }
 0x205   : > { %v1733_v58 = vmax.f32 %v1717_v54, 0.0  ;;  %v883_v59 = vpop.f32.mrb[12].mxu1  ;;  %p2456_p7 = por %p2455_p6, %p2454_p5 }
 0x206   : > { %v1734_v61 = vmax.f32 %v1718_v55, 0.0  ;;  %v885_v62 = vpop.f32.mrb[13].mxu1  ;;  %v1628_v63 = vpop.f32.mrb[8].mxu0  ;;  %vm1874_vm11 = vcmp.lt.s32.totalorder %v1873_v53, 4 }
 0x207   : > { %v1750_v0 = vpack.c.bf16 %v1733_v58, %v1731_v57  ;;  %v2187_v1 = vadd.f32 %v1628_v63, %v873_v35  ;;  %v887_v2 = vpop.f32.mrb[14].mxu1  ;;  %v1630_v3 = vpop.f32.mrb[9].mxu0  ;;  %v1890_v63 = vsub.s32 1, %v1873_v53  ;;  %p2457_p9 = pnand %p2456_p7, %p2450_p4 }
 0x208   : > { %v2188_v5 = vadd.f32 %v1630_v3, %v875_v39  ;;  %v889_v6 = vpop.f32.mrb[15].mxu1  ;;  %v1632_v7 = vpop.f32.mrb[10].mxu0  ;;  %v1751_v8 = vpack.c.bf16 %v1734_v61, %v1732_v60  ;;  %v1886_v61 = vsub.s32 0, %v1873_v53 }
 0x209   : > { %v1719_v9 = vadd.f32 %v2187_v1, %v1694_v56  ;;  %v2189_v10 = vadd.f32 %v1632_v7, %v877_v42  ;;  %v1634_v11 = vpop.f32.mrb[11].mxu0  ;;  %v1769_v52 = vpop.permute.xlu0 %1768 }
 0x20a   : > { %v1720_v13 = vadd.f32 %v2188_v5, %v1694_v56  ;;  %v2190_v14 = vadd.f32 %v1634_v11, %v879_v45  ;;  %1811 = vmatprep.subr.bf16.mxu1 %v1751_v8  ;;  %v2442_v45 = vld [vmem:[%s3066_s4 + $0x10] ss:$0 sps:$4 sm:$0xff]  }
 0x20b   : > { %v1721_v15 = vadd.f32 %v2189_v10, %v1699_v12  ;;  %1812 = vmatpush1.bf16.msra.mxu1 %v1750_v0  ;;  %v1735_v17 = vmax.f32 %v1719_v9, 0.0  ;;  %v1774_v0 = vpop.permute.xlu1 %1773 }
 0x20c   : > { %v1722_v16 = vadd.f32 %v2190_v14, %v1699_v12  ;;  %v1736_v19 = vmax.f32 %v1720_v13, 0.0 }
 0x20d   : > { %v1737_v18 = vmax.f32 %v1721_v15, 0.0  ;;  %v1779_v5 = vpop.permute.xlu0 %1778 }
 0x20e   : > { %v1738_v20 = vmax.f32 %v1722_v16, 0.0  ;;  %v1638_v21 = vpop.f32.mrb[12].mxu0 }
 0x20f   : > { %v1752_v22 = vpack.c.bf16 %v1737_v18, %v1735_v17  ;;  %v2191_v23 = vadd.f32 %v1638_v21, %v883_v59  ;;  %v1640_v24 = vpop.f32.mrb[13].mxu0  ;;  %v1784_v14 = vpop.permute.xlu1 %1783 }
 0x210   : > { %v2192_v26 = vadd.f32 %v1640_v24, %v885_v62  ;;  %v1642_v27 = vpop.f32.mrb[14].mxu0  ;;  %v1753_v28 = vpack.c.bf16 %v1738_v20, %v1736_v19  ;;  %v1883_v62 = vsel %vm1871_vm10, 1, %v2544_v4 }
 0x211   : > { %v1723_v29 = vadd.f32 %v2191_v23, %v1704_v25  ;;  %v2193_v30 = vadd.f32 %v1642_v27, %v887_v2  ;;  %v1644_v31 = vpop.f32.mrb[15].mxu0  ;;  %v1891_v9 = vrot.slane %v1883_v62, %v1890_v63 }
 0x212   : > { %v1724_v33 = vadd.f32 %v2192_v26, %v1704_v25  ;;  %v2194_v34 = vadd.f32 %v1644_v31, %v889_v6  ;;  %1813 = vmatprep.subr.bf16.mxu1 %v1753_v28  ;;  %v1887_v6 = vrot.slane %v1883_v62, %v1886_v61 }
 0x213   : > { %v1725_v35 = vadd.f32 %v2193_v30, %v1709_v32  ;;  %1814 = vmatpush1.bf16.msra.mxu1 %v1752_v22  ;;  %v1739_v37 = vmax.f32 %v1723_v29, 0.0  ;;  %vm1893_vm13 = vcmp.eq.s32.totalorder %v1891_v9, 1 }
 0x214   : > { %v1726_v36 = vadd.f32 %v2194_v34, %v1709_v32  ;;  %v1740_v39 = vmax.f32 %v1724_v33, 0.0  ;;  %vm1892_vm12 = vcmp.eq.s32.totalorder %v1887_v6, 1 }
 0x215   : > { %v1741_v38 = vmax.f32 %v1725_v35, 0.0 }
 0x216   : > { %v1742_v40 = vmax.f32 %v1726_v36, 0.0 }
 0x217   : > { %v1754_v41 = vpack.c.bf16 %v1741_v38, %v1739_v37 }
 0x218   : > { %v1755_v42 = vpack.c.bf16 %v1742_v40, %v1740_v39 }
 0x21a   : > { %1815 = vmatprep.subr.bf16.mxu1 %v1755_v42 }
 0x21b   : > { %1816 = vmatpush1.bf16.msra.mxu1 %v1754_v41 }
 0x21e   : > { %2172 = vmatmul.mubr.msk.bf16.vlgmr.msra.gmra.mrb[16].mxu1 %vm1799_vm9, %v2440_v43 }
 0x21f   : > { %1851 = vmatprep.mubr.bf16.mxu1 %v2544_v4 }
 0x226   : > { %2173 = vmatmul.mubr.msk.bf16.gmra.mrb[20].mxu1 %vm1799_vm9, %v2441_v44 }
 0x227   : > { %1861 = vmatprep.mubr.bf16.mxu1 %v2544_v4 }
 0x22e   : > { %2174 = vmatmul.mubr.msk.bf16.gmra.mrb[24].mxu1 %vm1799_vm9, %v2442_v45 }
 0x2f1   : > { %v1843_v48 = vpop.f32.mrb[16].mxu1 }
 0x2f2   : > { %v1844_v49 = vadd.f32 %v1843_v48, %v1764_v47  ;;  %v1845_v51 = vpop.f32.mrb[17].mxu1 }
 0x2f3   : > { %v1846_v54 = vadd.f32 %v1845_v51, %v1764_v47  ;;  %v1847_v55 = vpop.f32.mrb[18].mxu1 }
 0x2f4   : > { %v1875_v56 = vmul.f32 1.442695, %v1844_v49  ;;  %v1848_v57 = vadd.f32 %v1847_v55, %v1769_v52  ;;  %v1849_v58 = vpop.f32.mrb[19].mxu1 }
 0x2f5   : > { %v1877_v59 = vmul.f32 1.442695, %v1846_v54  ;;  %v1850_v60 = vadd.f32 %v1849_v58, %v1769_v52 }
 0x2f6   : > { %2443 = vpow2.f32 %v1875_v56  ;;  %1898 = vst [vmem:[%s2985_s24 + $0x10] sm:$0xff] %v1848_v57 }
 0x2f7   : > { %2445 = vpow2.f32 %v1877_v59  ;;  %1899 = vst [vmem:[%s2985_s24 + $0x18] sm:$0xff] %v1850_v60 }
 0x2f9   : > { %v1853_v1 = vpop.f32.mrb[20].mxu1 }
 0x2fa   : > { %v1854_v2 = vadd.f32 %v1853_v1, %v1774_v0  ;;  %v1855_v3 = vpop.f32.mrb[21].mxu1 }
 0x2fb   : > { %v1856_v7 = vadd.f32 %v1855_v3, %v1774_v0  ;;  %v1857_v8 = vpop.f32.mrb[22].mxu1 }
 0x2fc   : > { %1900 = vst [vmem:[%s2985_s24 + $0x20] sm:$0xff] %v1854_v2  ;;  %v1858_v10 = vadd.f32 %v1857_v8, %v1779_v5  ;;  %v1859_v11 = vpop.f32.mrb[23].mxu1 }
 0x2fd   : > { %1901 = vst [vmem:[%s2985_s24 + $0x28] sm:$0xff] %v1856_v7  ;;  %v1860_v12 = vadd.f32 %v1859_v11, %v1779_v5 }
 0x2fe   : > { %1902 = vst [vmem:[%s2985_s24 + $0x30] sm:$0xff] %v1858_v10 }
 0x2ff   : > { %1903 = vst [vmem:[%s2985_s24 + $0x38] sm:$0xff] %v1860_v12 }
 0x300   : > { %v2444_v4 = vpop.eup %2443 }
 0x301   : > { %v2446_v13 = vpop.eup %2445  ;;  %v1881_v15 = vsel %vm1874_vm11, %v2444_v4, 0.0  ;;  %v1863_v16 = vpop.f32.mrb[24].mxu1 }
 0x302   : > { %v1894_v17 = vsel %vm1892_vm12, %v1881_v15, 0.0  ;;  %v1882_v18 = vsel %vm1874_vm11, %v2446_v13, 0.0  ;;  %v1864_v19 = vadd.f32 %v1863_v16, %v1784_v14  ;;  %v1865_v20 = vpop.f32.mrb[25].mxu1 }
 0x303   : > { %1896 = vst [vmem:[%s2985_s24] sm:$0xff] %v1894_v17  ;;  %v1895_v21 = vsel %vm1893_vm13, %v1882_v18, 0.0  ;;  %v1866_v22 = vadd.f32 %v1865_v20, %v1784_v14  ;;  %v1867_v23 = vpop.f32.mrb[26].mxu1 }
 0x304   : > { %1897 = vst [vmem:[%s2985_s24 + $0x8] sm:$0xff] %v1895_v21  ;;  %1904 = vst [vmem:[%s2985_s24 + $0x40] sm:$0xff] %v1864_v19  ;;  %v1868_v24 = vpop.f32.mrb[27].mxu1 }
 0x305   : > { %1905 = vst [vmem:[%s2985_s24 + $0x48] sm:$0xff] %v1866_v22 }
 0x306   : > { %2460 = shalt.err (!%p2457_p9)
}
 0x307   : > { %s2461_s18 = scalar_lea.hbm %s3000_s16, 1280  ;;  %s2465_s12 = scalar_lea.hbm %s3068_s6, 5120 }
 0x308   : > { %p2462_p10 = scmp.ne.s32.totalorder %s3000_s16, %s2461_s18  ;;  %p2466_p13 = scmp.lt.u32.totalorder %s3000_s16, %s3068_s6 }
 0x309   : > { %p2467_p0 = scmp.lt.u32.totalorder %s2465_s12, %s2461_s18  ;;  %p2469_p2 = scmp.lt.u32.totalorder %s2461_s18, %s3000_s16 }
 0x30a   : > { %p2463_p11 = pnand %p2462_p10, %p2642_p3 }
 0x30b   : > { %p2468_p1 = por %p2467_p0, %p2466_p13 }
 0x30c   : > { %p2464_p12 = pneg %p2463_p11 }
 0x30d   : > { %p2470_p4 = por %p2469_p2, %p2468_p1 }
 0x30f   : > { %p2471_p5 = pnand %p2470_p4, %p2464_p12 }
 0x311   : > { %2474 = shalt.err (!%p2471_p5)
}
 0x312   : > { %s2553_s14 = smov 256   ;;  %s2554_s19 = smov 512  }
 0x313   : > { %s2555_s20 = smov 16  }
 0x314   : > { %2311 = dma.vmem_to_hbm [thread:$0]  (%p2642_p3), %s3002_s8, 1280, %s3000_s16, %s3010_s17, %s2553_s14, %s2554_s19, %s2555_s20  }
 0x315 PF: > { %p2317_p6 = scmp.ge.s32.totalorder %s2541_s28, 2  ;;  %s1937_s29 = sand.u32 1, %s2513_s21  }
 0x316   : > { %s1938_s30 = scalar_lea.sflag [#allocation3], %s1937_s29 }
 0x317   : > { %p2314_p7 = pnand %p2317_p6, %p2651_p8 }
 0x319   : > { %2508 = dma.done.wait (!%p2314_p7), %s1938_s30, 1280  }
 0x31a   : > { %2510 = vsyncadd (!%p2314_p7), %s1938_s30, 4294966016  ;;  %s19_s28 = sadd.s32 1, %s2541_s28   ;;  %s3073_s10 = sld [smem:[#allocation5_spill]] }
 0x31b   : > { %p16_p9 = scmp.ge.s32.totalorder %s19_s28, 6   ;;  %s3074_s21 = smov %s2517_s22 }
 0x31c   : > { %s3075_s22 = smov %s2521_s23  ;;  %s3076_s23 = smov %s2660_s15 }
 0x31d   : > { %s3077_s24 = smov %s2533_s26  ;;  %s3078_s25 = smov %s2537_s27 }
 0x31e   : > { %s3079_s26 = smov %s3082_s7  ;;  %18 = sbr.rel (!%p16_p9) target bundleno = 5 (0x5), region = 90 }
 0x320   : > { %s3080_s27 = smov %s3073_s10 }
 0x325   :  { %1943 = vsyncpa [#allocation3], 1 }
 0x326   :  { %1945 = vsyncpa [#allocation3 + $0x1], 1 }

</bundles_post_ra>
